<compile_context>
chip_gen: v7x
topology: tpu7x:2x2x1
jax: 0.10.0
libtpu: 0.0.40
codegen_flags: <defaults>
</compile_context>

<pallas_src>
import functools
import math

import jax
import jax.numpy as jnp
import numpy as np
from jax import lax
from jax.experimental import pallas as pl
from jax.experimental.pallas import tpu as pltpu

LANES = 128  # vreg lane width: the channel axis is zero-padded to this once, in the wrapper.


# ------------------------------ pltpu.roll convention probe ------------------------------

@functools.lru_cache(maxsize=None)
def _roll_sign():
    """pltpu.roll is expected to match np.roll (out[i] = x[(i - shift) % n]).  Probe once with
    a tiny kernel so the main kernel is robust either way (all shift args use this sign)."""
    def probe(x_ref, o_ref):
        o_ref[...] = pltpu.roll(x_ref[...], shift=1, axis=0)

    x = np.arange(8 * 128, dtype=np.float32).reshape(8, 128)
    y = np.asarray(jax.block_until_ready(
        pl.pallas_call(probe, out_shape=jax.ShapeDtypeStruct((8, 128), jnp.float32))(
            jnp.asarray(x))))
    if np.array_equal(y, np.roll(x, 1, axis=0)):
        return 1
    if np.array_equal(y, np.roll(x, -1, axis=0)):
        return -1
    raise RuntimeError("unexpected pltpu.roll semantics")


# ------------------------------ Fused Pallas kernel ------------------------------

def _simplenet_kernel(x_ref, w_ref, shift_ref, o_ref, *, layer_cfgs, batch_block, roll_sign):
    """Whole-network forward for `batch_block` batch elements stacked along rows.

    x_ref:     (batch_block * L0, 128)  channels-last activations, lanes >= Cin are zero.
    w_ref:     (n_layers, 128, 128)     per-layer im2col weights (BN scale folded in).
    shift_ref: (n_layers, 1, 128)       per-layer fused conv-bias/BN shift (zero pad lanes).
    o_ref:     (batch_block * L_out, 128)
    """
    cache = {}  # trace-time cache: every mask / selector is materialized at most once.

    def row_mask(rows, lb, d):
        # (rows, 1) 0/1 tap-validity mask: row l is valid iff its source row l + d stays
        # inside the same batch element's lb-row block (implements conv zero padding and
        # keeps stacked batch blocks from bleeding into each other).
        key = ("mask", rows, lb, d)
        if key not in cache:
            l = lax.broadcasted_iota(jnp.int32, (rows, 1), 0)
            ok = None
            for b in range(rows // lb):
                lo = b * lb
                vb = (l >= lo + max(0, -d)) & (l < lo + lb - max(0, d))
                ok = vb if ok is None else ok | vb
            cache[key] = ok.astype(jnp.float32)
        return cache[key]

    def row_select(rows_out, rows_in, lb_out, lb_in, step):
        # (rows_out, rows_in) block-diagonal 0/1 selector: output row b*lb_out + t picks
        # input row b*lb_in + t*step (stride-2 subsample / MaxPool even rows / both fused).
        key = ("sel", rows_out, rows_in, lb_out, lb_in, step)
        if key not in cache:
            r = lax.broadcasted_iota(jnp.int32, (rows_out, rows_in), 0)
            c = lax.broadcasted_iota(jnp.int32, (rows_out, rows_in), 1)
            hit = None
            for b in range(rows_out // lb_out):
                in_blk = (r >= b * lb_out) & (r < (b + 1) * lb_out)
                vb = in_blk & (c == r * step + b * (lb_in - lb_out * step))
                hit = vb if hit is None else hit | vb
            cache[key] = hit.astype(jnp.float32)
        return cache[key]

    def row_shift(y, d, lb):
        # Rows shifted so row l ~ y[l + d].  Rides the XLU sublane rotate (wrapped rows are
        # masked / never selected by callers); tiny sub-8-row arrays fall back to a 0/1
        # shift-selector matmul which also zero-fills across block boundaries.
        rows, _ = y.shape
        if d % rows == 0:
            return y
        if rows % 8 == 0:
            return pltpu.roll(y, shift=(roll_sign * (-d)) % rows, axis=0)
        key = ("shift", rows, lb, d)
        if key not in cache:
            r = lax.broadcasted_iota(jnp.int32, (rows, rows), 0)
            c = lax.broadcasted_iota(jnp.int32, (rows, rows), 1)
            hit = None
            for b in range(rows // lb):
                lo, hi = b * lb, (b + 1) * lb
                vb = (r >= lo) & (r < hi) & (c >= lo) & (c < hi) & (c == r + d)
                hit = vb if hit is None else hit | vb
            cache[key] = hit.astype(jnp.float32)
        return jnp.dot(cache[key], y, preferred_element_type=jnp.float32)

    x = x_ref[...]                                    # (B*L0, 128) lane-padded, channels-last
    for i, cfg in enumerate(layer_cfgs):
        K, cin, pad, lb = cfg["K"], cfg["cin"], cfg["pad"], cfg["lb"]
        rows = batch_block * lb

        # ---- Conv1d as ONE MXU matmul: 128-lane im2col LHS (tap k lives at lanes [k*cin,..)).
        if K == 1:
            a = x
        else:
            a = None
            for k in range(K):
                d = k - pad
                xs = x if d == 0 else row_shift(x, d, lb) * row_mask(rows, lb, d)
                if k:
                    xs = pltpu.roll(xs, shift=(roll_sign * k * cin) % LANES, axis=1)
                a = xs if a is None else a + xs
        y = jnp.dot(a, w_ref[i], preferred_element_type=jnp.float32)
        y = jnp.maximum(y + shift_ref[i], 0.0)        # fused conv-bias/BN shift + ReLU

        # ---- Fused stride-2 / MaxPool1d(2) epilogue: optional pairwise max + one selector.
        pool_roll, step, lb_out = cfg["pool_roll"], cfg["step"], cfg["lb_out"]
        if step > 1:
            if pool_roll:
                y = jnp.maximum(y, row_shift(y, pool_roll, lb))
            sel = row_select(batch_block * lb_out, rows, lb_out, lb, step)
            y = jnp.dot(sel, y, preferred_element_type=jnp.float32)
        x = y

    o_ref[...] = x.astype(o_ref.dtype)


# ------------------------------ Wrapper ------------------------------

def _pack_layers(params, cin0, l0):
    """Fold BN into the conv weights, lay them out for the 128-lane im2col, pack shifts."""
    n_layers = len(params)
    w_all = jnp.zeros((n_layers, LANES, LANES), jnp.float32)
    shift_all = jnp.zeros((n_layers, 1, LANES), jnp.float32)
    cfgs = []
    lb, cin = l0, cin0
    for i, p in enumerate(params):
        K, stride, pad, pool = p["K"], p["stride"], p["pad"], p["pool"]
        cout = int(p["w"].shape[2])
        # TODO(synk): kernel assumes "same-length" conv geometry (2*pad == K-1), as in SimpleNet1d.
        assert 2 * pad == K - 1, "only 'same' conv geometry is supported"
        assert K * cin <= LANES and cout <= LANES

        w_folded = p["w"].astype(jnp.float32) * p["scale"][None, None, :].astype(jnp.float32)
        w_all = w_all.at[i, : K * cin, :cout].set(w_folded.reshape(K * cin, cout))
        shift_all = shift_all.at[i, 0, :cout].set(p["shift"].astype(jnp.float32))

        if stride == 2 and pool:          # conv stride-2 + MaxPool(2) fused: max(y[4t], y[4t+2])
            pool_roll, step = 2, 4
            lb_out = ((lb + 1) // 2) // 2
        elif stride == 2:                 # conv stride-2: keep rows 2t
            pool_roll, step = 0, 2
            lb_out = (lb + 1) // 2
        elif pool:                        # MaxPool(2): max(y, y[+1]) then keep rows 2t
            pool_roll, step = 1, 2
            lb_out = lb // 2
        else:
            pool_roll, step, lb_out = 0, 1, lb
        cfgs.append(dict(K=K, cin=cin, pad=pad, lb=lb,
                         pool_roll=pool_roll, step=step, lb_out=lb_out))
        lb, cin = lb_out, cout
    return w_all, shift_all, tuple(cfgs), lb, cin


def _default_batch_block(n):
    """v7x has 2 TensorCores: keep one batch element per ("parallel") grid step so the batch
    is sharded across cores.  Single-TC chips (v5e/v6e): fold the whole batch into one grid
    step to amortize the fixed per-step overhead and get taller MXU tiles."""
    try:
        kind = jax.devices()[0].device_kind.lower()
    except Exception:
        kind = ""
    if ("v7" in kind or "7x" in kind) and n > 1:
        return 1
    return n


def simplenet1d_forward(x_ncl, params, batch_block=None):
    """Fused SimpleNet1d forward.  x_ncl: (N, Cin, L) NCL.  Returns NCL output."""
    N, cin0, l0 = x_ncl.shape
    if batch_block is None:
        batch_block = _default_batch_block(N)
    if N % batch_block != 0:
        batch_block = 1
    B = batch_block
    G = N // B

    w_all, shift_all, cfgs, l_final, c_final = _pack_layers(params, cin0, l0)
    n_layers = len(params)

    # NCL -> NLC, pad channels to the 128-lane axis once, fold B batch elements onto rows.
    x_nlc = jnp.transpose(x_ncl, (0, 2, 1)).astype(jnp.float32)
    x_pad = jnp.zeros((N, l0, LANES), jnp.float32).at[:, :, :cin0].set(x_nlc)
    x_rows = x_pad.reshape(G, B * l0, LANES)

    kernel = functools.partial(_simplenet_kernel, layer_cfgs=cfgs, batch_block=B,
                               roll_sign=_roll_sign())
    out_rows = pl.pallas_call(
        kernel,
        out_shape=jax.ShapeDtypeStruct((G, B * l_final, LANES), jnp.float32),
        grid=(G,),
        in_specs=[
            pl.BlockSpec((None, B * l0, LANES), lambda g: (g, 0, 0)),
            pl.BlockSpec((n_layers, LANES, LANES), lambda g: (0, 0, 0)),
            pl.BlockSpec((n_layers, 1, LANES), lambda g: (0, 0, 0)),
        ],
        out_specs=pl.BlockSpec((None, B * l_final, LANES), lambda g: (g, 0, 0)),
        compiler_params=pltpu.CompilerParams(
            dimension_semantics=("parallel",)),       # batch sharded across TCs on v7x
    )(x_rows, w_all, shift_all)

    out = out_rows.reshape(N, l_final, LANES)[:, :, :c_final]    # drop lane padding
    return jnp.transpose(out, (0, 2, 1))                         # NLC -> NCL


# ------------------------------ Parameters ------------------------------

def make_conv_bn_params(key, cin, cout, K, stride, pad, pool):
    k1, k2, k3, k4, k5, k6 = jax.random.split(key, 6)
    bound = 1.0 / math.sqrt(cin * K)
    w = jax.random.uniform(k1, (K, cin, cout), jnp.float32, -bound, bound)
    b = jax.random.uniform(k2, (cout,), jnp.float32, -bound, bound)
    gamma = jax.random.uniform(k3, (cout,), jnp.float32, 0.5, 1.5)
    beta = jax.random.uniform(k4, (cout,), jnp.float32, -0.1, 0.1)
    mean = jax.random.uniform(k5, (cout,), jnp.float32, -0.1, 0.1)
    var = jax.random.uniform(k6, (cout,), jnp.float32, 0.5, 1.5)
    eps = 1e-5
    scale = gamma / jnp.sqrt(var + eps)
    shift = (b - mean) * scale + beta
    return dict(w=w, b=b, gamma=gamma, beta=beta, mean=mean, var=var,
                scale=scale, shift=shift, K=K, stride=stride, pad=pad, pool=pool)


# ------------------------------ Reference (pure JAX/XLA) ------------------------------

def ref_conv_bn_relu(x_ncl, p):
    w = jnp.transpose(p['w'], (2, 1, 0))     # (Cout, Cin, K)
    z = lax.conv_general_dilated(
        x_ncl, w, window_strides=(p['stride'],), padding=[(p['pad'], p['pad'])],
        dimension_numbers=('NCH', 'OIH', 'NCH'))
    z = z + p['b'][None, :, None]
    z = (z - p['mean'][None, :, None]) / jnp.sqrt(p['var'][None, :, None] + 1e-5)
    z = z * p['gamma'][None, :, None] + p['beta'][None, :, None]
    return jnp.maximum(z, 0.0)


def ref_maxpool(x_ncl):
    N, C, L = x_ncl.shape
    Lh = L // 2
    return x_ncl[:, :, :2 * Lh].reshape(N, C, Lh, 2).max(axis=-1)


def ref_forward(x_ncl, params):
    x = x_ncl
    for p in params:
        x = ref_conv_bn_relu(x, p)
        if p['pool']:
            x = ref_maxpool(x)
    return x


# ------------------------------ Main ------------------------------

if __name__ == "__main__":
    in_channels = 4
    filters = [8, 16, 32]
    N, L = 2, 64

    # (cin, cout, K, stride, pad, maxpool-after) for every Conv1d+BN+ReLU in SimpleNet1d
    conv_cfgs = [
        (in_channels, filters[0], 7, 2, 3, False),          # conv1, layer 0
        (filters[0], filters[0], 7, 2, 3, True),            # conv1, layer 1 + maxpool1
        (filters[0], filters[1], 3, 1, 1, False),           # conv2, layer 0
        (filters[1], filters[1], 3, 1, 1, True),            # conv2, layer 1 + maxpool2
        (filters[1], filters[2] // 4, 1, 1, 0, False),      # conv3 ...
        (filters[2] // 4, filters[2] // 2, 3, 1, 1, False),
        (filters[2] // 2, filters[2] // 2, 1, 1, 0, False),
        (filters[2] // 2, filters[2], 3, 1, 1, True),       # ... + maxpool3
    ]

    key = jax.random.PRNGKey(0)
    keys = jax.random.split(key, len(conv_cfgs) + 1)
    params = [make_conv_bn_params(keys[i], *cfg) for i, cfg in enumerate(conv_cfgs)]
    x = jax.random.normal(keys[-1], (N, in_channels, L), jnp.float32)   # NCL input

    out = simplenet1d_forward(x, params)
    out = jax.block_until_ready(out)

    ref = ref_forward(x, params)
    np.testing.assert_allclose(np.asarray(out), np.asarray(ref), rtol=5e-3, atol=5e-3)
    assert out.shape == (N, filters[2], 2), out.shape

    print("KERNEL_OK")
</pallas_src>

<mosaic_0001>
module attributes {stable_mosaic.version = 11 : i64} {
  func.func @probe(%arg0: memref<8x128xf32, #tpu.memory_space<vmem>>, %arg1: memref<8x128xf32, #tpu.memory_space<vmem>>) attributes {dimension_semantics = [], scalar_prefetch = 0 : i64, scratch_operands = 0 : i64, tpu.core_type = #tpu.core_type<tc>} {
    %c0 = arith.constant 0 : index
    %c0_0 = arith.constant 0 : index
    %0 = vector.load %arg0[%c0, %c0_0] : memref<8x128xf32, #tpu.memory_space<vmem>>, vector<8x128xf32>
    %c1_i32 = arith.constant 1 : i32
    %1 = tpu.dynamic_rotate %0 by %c1_i32 dim 0 : vector<8x128xf32>, i32 -> vector<8x128xf32>
    %c0_1 = arith.constant 0 : index
    %c0_2 = arith.constant 0 : index
    %2 = vector.load %arg1[%c0_1, %c0_2] : memref<8x128xf32, #tpu.memory_space<vmem>>, vector<8x128xf32>
    tpu.vector_store %arg1[%c0_1, %c0_2], %1 {strides = array<i32>} : memref<8x128xf32, #tpu.memory_space<vmem>>, vector<8x128xf32>,
    return
  }
}

</mosaic_0001>

<bundles_post_ra>
// kernel: tpu_custom_call.1
= control target key start
LH: loop header
LB: loop body
LE: loop exit
PB: predicated region body
PF: predicated region fallthrough
CT: control target
= control target key end

     0   :  { %6 = vsyncpa [#allocation3], 0  ;;  %s125_s0 = inlined_call_operand.hbm [shape: f32[8,128], index: 0, kind: input, shape index: {}]   ;;  %s126_s1 = inlined_call_operand.hbm [shape: f32[8,128], index: 1, kind: output, shape index: {}]  }
   0x1   :  { %7 = vsyncpa [#allocation4], 0  ;;  %s89_s6 = smov [#allocation2]   ;;  %s41_s10 = scalar_lea.hbm %s125_s0, 128 }
   0x2   :  { %s14_s7 = sshll.u32 %s89_s6, 4  ;;  %p42_p0 = scmp.ne.s32.totalorder %s125_s0, %s41_s10  ;;  %s15_s7 = int_to_ptr.vmem [resolvable:$true] %s14_s7 }
   0x3   :  { %p45_p1 = scmp.lt.u32.totalorder %s41_s10, %s125_s0 }
   0x5   :  { %p47_p2 = pnand %p45_p1, %p42_p0 }
   0x7   :  { %50 = shalt.err (!%p47_p2)
}
   0x8   :  { %s51_s15 = scalar_lea.vmem %s15_s7, 128  ;;  %p56_p4 = scmp.lt.s32.totalorder %s15_s7, %s15_s7 }
   0x9   :  { %p52_p3 = scmp.ne.s32.totalorder %s15_s7, %s51_s15  ;;  %p57_p5 = scmp.lt.s32.totalorder %s51_s15, %s51_s15 }
   0xb   :  { %p58_p6 = por %p57_p5, %p56_p4 }
   0xd   :  { %p59_p7 = pnand %p58_p6, %p52_p3 }
   0xf   :  { %62 = shalt.err (!%p59_p7)
}
  0x10   :  { %17 = dma.hbm_to_vmem [thread:$0]  %s125_s0, 128, %s15_s7, [#allocation3]  }
  0x11   :  { %85 = dma.done.wait [#allocation3], 128  }
  0x12   :  { %86 = vsyncadd [#allocation3], 4294967168  ;;  %s90_s18 = smov [#allocation5]   ;;  %v21_v0 = vld [vmem:[#allocation2] sm:$0xff] }
  0x13   :  { %s30_s19 = sshll.u32 %s90_s18, 4  ;;  %v22_v1 = vrot.slane %v21_v0, 7  ;;  %s31_s19 = int_to_ptr.vmem [resolvable:$true] %s30_s19 }
  0x14   :  { %s63_s20 = scalar_lea.vmem %s31_s19, 128  ;;  %p68_p9 = scmp.lt.s32.totalorder %s31_s19, %s31_s19 }
  0x15   :  { %23 = vst [vmem:[#allocation5] sm:$0xff] %v22_v1  ;;  %p64_p8 = scmp.ne.s32.totalorder %s31_s19, %s63_s20  ;;  %p69_p10 = scmp.lt.s32.totalorder %s63_s20, %s63_s20 }
  0x17   :  { %p70_p11 = por %p69_p10, %p68_p9 }
  0x19   :  { %p71_p12 = pnand %p70_p11, %p64_p8 }
  0x1b   :  { %74 = shalt.err (!%p71_p12)
}
  0x1c   :  { %s75_s23 = scalar_lea.hbm %s126_s1, 128 }
  0x1d   :  { %p76_p13 = scmp.ne.s32.totalorder %s126_s1, %s75_s23  ;;  %p79_p0 = scmp.lt.u32.totalorder %s75_s23, %s126_s1 }
  0x1f   :  { %p81_p1 = pnand %p79_p0, %p76_p13 }
  0x21   :  { %84 = shalt.err (!%p81_p1)
}
  0x22   :  { %33 = dma.vmem_to_hbm [thread:$0]  %s31_s19, 128, %s126_s1, [#allocation4]  }
  0x23   :  { %87 = dma.done.wait [#allocation4], 128  }
  0x24   :  { %88 = vsyncadd [#allocation4], 4294967168 }
  0x25   :  { %37 = vsyncpa [#allocation3], 1 }
  0x26   :  { %38 = vsyncpa [#allocation4], 1 }

</bundles_post_ra>
